<compile_context>
chip_gen: v5e
topology: v5e:2x2
jax: 0.10.0
libtpu: 0.0.40
codegen_flags: <defaults>
</compile_context>

<pallas_src>
import math
from functools import partial

import jax
import jax.numpy as jnp
from jax import lax
from jax.experimental import pallas as pl
from jax.experimental.pallas import tpu as pltpu


def _round_up(x, m):
    return (x + m - 1) // m * m


def _conv_meanpool_kernel(x_ref, w_ref, b_ref, o_ref, *, Ho, Wo, Cin):
    """One batch element per grid step.

    x_ref: (1, Ho+1, 2, Wo+1, 2*Cin) bf16  zero-padded NHWC input; H split into
           (row-pair, row-parity) and the W pair folded into the channel dim.
    w_ref: (8, 2*Cin, Cout_p)        bf16  folded 4x4/stride-2 weights grouped
           by (row tap a, column-pair c) with t = 2*a + c.
    b_ref: (1, Cout_p)               f32
    o_ref: (1, Ho*Wo, Cout_p)        f32
    """
    HoWo = Ho * Wo
    Cout_p = o_ref.shape[-1]
    acc = jnp.zeros((HoWo, Cout_p), jnp.float32)
    # 16 taps of the effective 4x4 kernel, processed as 8 groups of 2:
    # adjacent W taps share one contiguous 2*Cin channel slab.
    for t in range(8):
        a, c = divmod(t, 2)        # a: row tap 0..3, c: column-pair 0..1
        q, p = divmod(a, 2)        # q: row-pair offset, p: row parity
        g = x_ref[0, q:q + Ho, p, c:c + Wo, :]            # (Ho, Wo, 2*Cin)
        acc = acc + jnp.dot(g.reshape(HoWo, 2 * Cin), w_ref[t],
                            preferred_element_type=jnp.float32)
    o_ref[0] = (acc + b_ref[...]).astype(o_ref.dtype)


def conv_mean_pool(x_nchw, weight_oihw, bias, *, adjust_padding=False,
                   spec_norm=False, compute_dtype=jnp.bfloat16):
    """ConvMeanPool forward. x_nchw: (N, Cin, H, W) -> (N, Cout, H//2, W//2)."""
    if adjust_padding or spec_norm:
        # TODO(synk): ZeroPad2d((1,0,1,0)) branch and spectral_norm power
        # iteration are not implemented; reject loudly instead of silently.
        raise NotImplementedError("adjust_padding / spec_norm not supported")

    N, Cin, H, W = x_nchw.shape
    Cout, Cin_w, k, k2 = weight_oihw.shape
    assert k == 3 and k2 == 3 and Cin_w == Cin
    assert H % 2 == 0 and W % 2 == 0
    Ho, Wo = H // 2, W // 2
    Cout_p = _round_up(Cout, 128)

    # ---- glue (single bf16 pass): cast early, NHWC, zero-pad by 1, then a
    # free reshape to (N, Ho+1, 2, Wo+1, 2*Cin): H -> (pair, parity), W-pair
    # folded into the channel dim so the kernel only needs contiguous slices.
    x = jnp.transpose(x_nchw.astype(compute_dtype), (0, 2, 3, 1))    # NHWC
    x_pad = jnp.pad(x, ((0, 0), (1, 1), (1, 1), (0, 0)))             # (N,H+2,W+2,Cin)
    x_r = x_pad.reshape(N, Ho + 1, 2, Wo + 1, 2 * Cin)

    # ---- effective 4x4 stride-2 kernel folding conv3x3 + 2x2 mean pool,
    # regrouped to (8, 2*Cin, Cout_p): group t = 2*a + b//2, rows = (b%2, ci).
    w_hwio = jnp.transpose(weight_oihw, (2, 3, 1, 0)).astype(jnp.float32)  # (3,3,Ci,Co)
    w_eff = jnp.zeros((4, 4, Cin, Cout), jnp.float32)
    for dy in (0, 1):
        for dx in (0, 1):
            w_eff = w_eff.at[dy:dy + 3, dx:dx + 3].add(w_hwio)
    w_eff = w_eff * 0.25
    w_g = w_eff.reshape(8, 2 * Cin, Cout)                 # row-major => t = 2a + b//2
    w_g = jnp.pad(w_g, ((0, 0), (0, 0), (0, Cout_p - Cout))).astype(compute_dtype)
    b2d = jnp.pad(bias.astype(jnp.float32), (0, Cout_p - Cout)).reshape(1, Cout_p)

    kernel = partial(_conv_meanpool_kernel, Ho=Ho, Wo=Wo, Cin=Cin)
    out = pl.pallas_call(
        kernel,
        out_shape=jax.ShapeDtypeStruct((N, Ho * Wo, Cout_p), jnp.float32),
        grid_spec=pltpu.PrefetchScalarGridSpec(
            num_scalar_prefetch=0,
            grid=(N,),
            in_specs=[
                pl.BlockSpec((1, Ho + 1, 2, Wo + 1, 2 * Cin),
                             lambda n: (n, 0, 0, 0, 0)),
                pl.BlockSpec((8, 2 * Cin, Cout_p), lambda n: (0, 0, 0)),  # resident
                pl.BlockSpec((1, Cout_p), lambda n: (0, 0)),              # resident
            ],
            out_specs=pl.BlockSpec((1, Ho * Wo, Cout_p), lambda n: (n, 0, 0)),
        ),
        compiler_params=pltpu.CompilerParams(
            dimension_semantics=("parallel",),
            vmem_limit_bytes=32 * 1024 * 1024,   # safe on v5e/v6e/v7x; per-step
                                                 # footprint for NCSN sizes << 32 MiB
        ),
    )(x_r, w_g, b2d)

    out = out[:, :, :Cout].reshape(N, Ho, Wo, Cout)
    return jnp.transpose(out, (0, 3, 1, 2))                # back to NCHW


def _reference(x_nchw, weight_oihw, bias):
    """Pure-JAX f32 reference replicating the PyTorch forward."""
    out = lax.conv_general_dilated(
        x_nchw, weight_oihw,
        window_strides=(1, 1),
        padding=((1, 1), (1, 1)),
        dimension_numbers=("NCHW", "OIHW", "NCHW"),
    )
    out = out + bias[None, :, None, None]
    pooled = (out[:, :, ::2, ::2] + out[:, :, 1::2, ::2]
              + out[:, :, ::2, 1::2] + out[:, :, 1::2, 1::2]) / 4.0
    return pooled


if __name__ == "__main__":
    key = jax.random.PRNGKey(0)
    kx, kw, kb = jax.random.split(key, 3)

    N, Cin, H, W = 2, 4, 16, 16
    Cout, ksize = 8, 3

    x = jax.random.normal(kx, (N, Cin, H, W), jnp.float32)

    # Deterministic parameter init (Conv2d-style uniform bounds).
    fan_in = Cin * ksize * ksize
    bound = 1.0 / math.sqrt(fan_in)
    weight = jax.random.uniform(kw, (Cout, Cin, ksize, ksize), jnp.float32,
                                -bound, bound)
    bias = jax.random.uniform(kb, (Cout,), jnp.float32, -bound, bound)

    out = conv_mean_pool(x, weight, bias)
    out = jax.block_until_ready(out)

    ref = _reference(x, weight, bias)
    assert out.shape == ref.shape == (N, Cout, H // 2, W // 2), (out.shape, ref.shape)
    # bf16 MXU inputs with f32 accumulation -> slightly looser tolerance.
    assert jnp.allclose(out, ref, atol=2e-2, rtol=2e-2), float(
        jnp.max(jnp.abs(out - ref)))

    print("KERNEL_OK")
</pallas_src>

<mosaic_0001>
module attributes {stable_mosaic.version = 11 : i64} {
  func.func @_conv_meanpool_kernel(%arg0: i32, %arg1: memref<1x9x2x9x8xbf16, #tpu.memory_space<vmem>>, %arg2: memref<8x8x128xbf16, #tpu.memory_space<vmem>>, %arg3: memref<1x128xf32, #tpu.memory_space<vmem>>, %arg4: memref<1x64x128xf32, #tpu.memory_space<vmem>>) attributes {dimension_semantics = [#tpu.dimension_semantics<parallel>], iteration_bounds = array<i64: 2>, scalar_prefetch = 0 : i64, scratch_operands = 0 : i64, tpu.core_type = #tpu.core_type<tc>, window_params = [{transform_indices = @transform_0, window_bounds = array<i64: 1, 9, 2, 9, 8>}, {pipeline_mode = #tpu.pipeline_mode<synchronous>, transform_indices = @transform_1, window_bounds = array<i64: 8, 8, 128>}, {pipeline_mode = #tpu.pipeline_mode<synchronous>, transform_indices = @transform_2, window_bounds = array<i64: 1, 128>}, {transform_indices = @transform_3, window_bounds = array<i64: 1, 64, 128>}]} {
    %cst = arith.constant 0.000000e+00 : f32
    %0 = vector.broadcast %cst : f32 to vector<64x128xf32>
    %c0 = arith.constant 0 : index
    %c0_0 = arith.constant 0 : index
    %c0_1 = arith.constant 0 : index
    %c0_2 = arith.constant 0 : index
    %c0_3 = arith.constant 0 : index
    %1 = vector.load %arg1[%c0, %c0_0, %c0_1, %c0_2, %c0_3] : memref<1x9x2x9x8xbf16, #tpu.memory_space<vmem>>, vector<1x8x1x8x8xbf16>
    %2 = vector.shape_cast %1 : vector<1x8x1x8x8xbf16> to vector<8x8x8xbf16>
    %3 = vector.shape_cast %2 : vector<8x8x8xbf16> to vector<64x8xbf16>
    %c0_4 = arith.constant 0 : index
    %c0_5 = arith.constant 0 : index
    %c0_6 = arith.constant 0 : index
    %4 = vector.load %arg2[%c0_4, %c0_5, %c0_6] : memref<8x8x128xbf16, #tpu.memory_space<vmem>>, vector<1x8x128xbf16>
    %5 = vector.shape_cast %4 : vector<1x8x128xbf16> to vector<8x128xbf16>
    %cst_7 = arith.constant dense<0.000000e+00> : vector<64x128xf32>
    %6 = tpu.matmul %3, %5, %cst_7 {dimension_numbers = #tpu.dot_dimension_numbers<[1], [0], [0], [1], [0, 0, 1, 1], [], []>} : vector<64x8xbf16>, vector<8x128xbf16>, vector<64x128xf32> -> vector<64x128xf32>
    %7 = arith.addf %0, %6 : vector<64x128xf32>
    %c0_8 = arith.constant 0 : index
    %c0_9 = arith.constant 0 : index
    %c0_10 = arith.constant 0 : index
    %c1 = arith.constant 1 : index
    %c0_11 = arith.constant 0 : index
    %8 = vector.load %arg1[%c0_8, %c0_9, %c0_10, %c1, %c0_11] : memref<1x9x2x9x8xbf16, #tpu.memory_space<vmem>>, vector<1x8x1x8x8xbf16>
    %9 = vector.shape_cast %8 : vector<1x8x1x8x8xbf16> to vector<8x8x8xbf16>
    %10 = vector.shape_cast %9 : vector<8x8x8xbf16> to vector<64x8xbf16>
    %c1_12 = arith.constant 1 : index
    %c0_13 = arith.constant 0 : index
    %c0_14 = arith.constant 0 : index
    %11 = vector.load %arg2[%c1_12, %c0_13, %c0_14] : memref<8x8x128xbf16, #tpu.memory_space<vmem>>, vector<1x8x128xbf16>
    %12 = vector.shape_cast %11 : vector<1x8x128xbf16> to vector<8x128xbf16>
    %cst_15 = arith.constant dense<0.000000e+00> : vector<64x128xf32>
    %13 = tpu.matmul %10, %12, %cst_15 {dimension_numbers = #tpu.dot_dimension_numbers<[1], [0], [0], [1], [0, 0, 1, 1], [], []>} : vector<64x8xbf16>, vector<8x128xbf16>, vector<64x128xf32> -> vector<64x128xf32>
    %14 = arith.addf %7, %13 : vector<64x128xf32>
    %c0_16 = arith.constant 0 : index
    %c0_17 = arith.constant 0 : index
    %c1_18 = arith.constant 1 : index
    %c0_19 = arith.constant 0 : index
    %c0_20 = arith.constant 0 : index
    %15 = vector.load %arg1[%c0_16, %c0_17, %c1_18, %c0_19, %c0_20] : memref<1x9x2x9x8xbf16, #tpu.memory_space<vmem>>, vector<1x8x1x8x8xbf16>
    %16 = vector.shape_cast %15 : vector<1x8x1x8x8xbf16> to vector<8x8x8xbf16>
    %17 = vector.shape_cast %16 : vector<8x8x8xbf16> to vector<64x8xbf16>
    %c2 = arith.constant 2 : index
    %c0_21 = arith.constant 0 : index
    %c0_22 = arith.constant 0 : index
    %18 = vector.load %arg2[%c2, %c0_21, %c0_22] : memref<8x8x128xbf16, #tpu.memory_space<vmem>>, vector<1x8x128xbf16>
    %19 = vector.shape_cast %18 : vector<1x8x128xbf16> to vector<8x128xbf16>
    %cst_23 = arith.constant dense<0.000000e+00> : vector<64x128xf32>
    %20 = tpu.matmul %17, %19, %cst_23 {dimension_numbers = #tpu.dot_dimension_numbers<[1], [0], [0], [1], [0, 0, 1, 1], [], []>} : vector<64x8xbf16>, vector<8x128xbf16>, vector<64x128xf32> -> vector<64x128xf32>
    %21 = arith.addf %14, %20 : vector<64x128xf32>
    %c0_24 = arith.constant 0 : index
    %c0_25 = arith.constant 0 : index
    %c1_26 = arith.constant 1 : index
    %c1_27 = arith.constant 1 : index
    %c0_28 = arith.constant 0 : index
    %22 = vector.load %arg1[%c0_24, %c0_25, %c1_26, %c1_27, %c0_28] : memref<1x9x2x9x8xbf16, #tpu.memory_space<vmem>>, vector<1x8x1x8x8xbf16>
    %23 = vector.shape_cast %22 : vector<1x8x1x8x8xbf16> to vector<8x8x8xbf16>
    %24 = vector.shape_cast %23 : vector<8x8x8xbf16> to vector<64x8xbf16>
    %c3 = arith.constant 3 : index
    %c0_29 = arith.constant 0 : index
    %c0_30 = arith.constant 0 : index
    %25 = vector.load %arg2[%c3, %c0_29, %c0_30] : memref<8x8x128xbf16, #tpu.memory_space<vmem>>, vector<1x8x128xbf16>
    %26 = vector.shape_cast %25 : vector<1x8x128xbf16> to vector<8x128xbf16>
    %cst_31 = arith.constant dense<0.000000e+00> : vector<64x128xf32>
    %27 = tpu.matmul %24, %26, %cst_31 {dimension_numbers = #tpu.dot_dimension_numbers<[1], [0], [0], [1], [0, 0, 1, 1], [], []>} : vector<64x8xbf16>, vector<8x128xbf16>, vector<64x128xf32> -> vector<64x128xf32>
    %28 = arith.addf %21, %27 : vector<64x128xf32>
    %c0_32 = arith.constant 0 : index
    %c1_33 = arith.constant 1 : index
    %c0_34 = arith.constant 0 : index
    %c0_35 = arith.constant 0 : index
    %c0_36 = arith.constant 0 : index
    %29 = vector.load %arg1[%c0_32, %c1_33, %c0_34, %c0_35, %c0_36] : memref<1x9x2x9x8xbf16, #tpu.memory_space<vmem>>, vector<1x8x1x8x8xbf16>
    %30 = vector.shape_cast %29 : vector<1x8x1x8x8xbf16> to vector<8x8x8xbf16>
    %31 = vector.shape_cast %30 : vector<8x8x8xbf16> to vector<64x8xbf16>
    %c4 = arith.constant 4 : index
    %c0_37 = arith.constant 0 : index
    %c0_38 = arith.constant 0 : index
    %32 = vector.load %arg2[%c4, %c0_37, %c0_38] : memref<8x8x128xbf16, #tpu.memory_space<vmem>>, vector<1x8x128xbf16>
    %33 = vector.shape_cast %32 : vector<1x8x128xbf16> to vector<8x128xbf16>
    %cst_39 = arith.constant dense<0.000000e+00> : vector<64x128xf32>
    %34 = tpu.matmul %31, %33, %cst_39 {dimension_numbers = #tpu.dot_dimension_numbers<[1], [0], [0], [1], [0, 0, 1, 1], [], []>} : vector<64x8xbf16>, vector<8x128xbf16>, vector<64x128xf32> -> vector<64x128xf32>
    %35 = arith.addf %28, %34 : vector<64x128xf32>
    %c0_40 = arith.constant 0 : index
    %c1_41 = arith.constant 1 : index
    %c0_42 = arith.constant 0 : index
    %c1_43 = arith.constant 1 : index
    %c0_44 = arith.constant 0 : index
    %36 = vector.load %arg1[%c0_40, %c1_41, %c0_42, %c1_43, %c0_44] : memref<1x9x2x9x8xbf16, #tpu.memory_space<vmem>>, vector<1x8x1x8x8xbf16>
    %37 = vector.shape_cast %36 : vector<1x8x1x8x8xbf16> to vector<8x8x8xbf16>
    %38 = vector.shape_cast %37 : vector<8x8x8xbf16> to vector<64x8xbf16>
    %c5 = arith.constant 5 : index
    %c0_45 = arith.constant 0 : index
    %c0_46 = arith.constant 0 : index
    %39 = vector.load %arg2[%c5, %c0_45, %c0_46] : memref<8x8x128xbf16, #tpu.memory_space<vmem>>, vector<1x8x128xbf16>
    %40 = vector.shape_cast %39 : vector<1x8x128xbf16> to vector<8x128xbf16>
    %cst_47 = arith.constant dense<0.000000e+00> : vector<64x128xf32>
    %41 = tpu.matmul %38, %40, %cst_47 {dimension_numbers = #tpu.dot_dimension_numbers<[1], [0], [0], [1], [0, 0, 1, 1], [], []>} : vector<64x8xbf16>, vector<8x128xbf16>, vector<64x128xf32> -> vector<64x128xf32>
    %42 = arith.addf %35, %41 : vector<64x128xf32>
    %c0_48 = arith.constant 0 : index
    %c1_49 = arith.constant 1 : index
    %c1_50 = arith.constant 1 : index
    %c0_51 = arith.constant 0 : index
    %c0_52 = arith.constant 0 : index
    %43 = vector.load %arg1[%c0_48, %c1_49, %c1_50, %c0_51, %c0_52] : memref<1x9x2x9x8xbf16, #tpu.memory_space<vmem>>, vector<1x8x1x8x8xbf16>
    %44 = vector.shape_cast %43 : vector<1x8x1x8x8xbf16> to vector<8x8x8xbf16>
    %45 = vector.shape_cast %44 : vector<8x8x8xbf16> to vector<64x8xbf16>
    %c6 = arith.constant 6 : index
    %c0_53 = arith.constant 0 : index
    %c0_54 = arith.constant 0 : index
    %46 = vector.load %arg2[%c6, %c0_53, %c0_54] : memref<8x8x128xbf16, #tpu.memory_space<vmem>>, vector<1x8x128xbf16>
    %47 = vector.shape_cast %46 : vector<1x8x128xbf16> to vector<8x128xbf16>
    %cst_55 = arith.constant dense<0.000000e+00> : vector<64x128xf32>
    %48 = tpu.matmul %45, %47, %cst_55 {dimension_numbers = #tpu.dot_dimension_numbers<[1], [0], [0], [1], [0, 0, 1, 1], [], []>} : vector<64x8xbf16>, vector<8x128xbf16>, vector<64x128xf32> -> vector<64x128xf32>
    %49 = arith.addf %42, %48 : vector<64x128xf32>
    %c0_56 = arith.constant 0 : index
    %c1_57 = arith.constant 1 : index
    %c1_58 = arith.constant 1 : index
    %c1_59 = arith.constant 1 : index
    %c0_60 = arith.constant 0 : index
    %50 = vector.load %arg1[%c0_56, %c1_57, %c1_58, %c1_59, %c0_60] : memref<1x9x2x9x8xbf16, #tpu.memory_space<vmem>>, vector<1x8x1x8x8xbf16>
    %51 = vector.shape_cast %50 : vector<1x8x1x8x8xbf16> to vector<8x8x8xbf16>
    %52 = vector.shape_cast %51 : vector<8x8x8xbf16> to vector<64x8xbf16>
    %c7 = arith.constant 7 : index
    %c0_61 = arith.constant 0 : index
    %c0_62 = arith.constant 0 : index
    %53 = vector.load %arg2[%c7, %c0_61, %c0_62] : memref<8x8x128xbf16, #tpu.memory_space<vmem>>, vector<1x8x128xbf16>
    %54 = vector.shape_cast %53 : vector<1x8x128xbf16> to vector<8x128xbf16>
    %cst_63 = arith.constant dense<0.000000e+00> : vector<64x128xf32>
    %55 = tpu.matmul %52, %54, %cst_63 {dimension_numbers = #tpu.dot_dimension_numbers<[1], [0], [0], [1], [0, 0, 1, 1], [], []>} : vector<64x8xbf16>, vector<8x128xbf16>, vector<64x128xf32> -> vector<64x128xf32>
    %56 = arith.addf %49, %55 : vector<64x128xf32>
    %c0_64 = arith.constant 0 : index
    %c0_65 = arith.constant 0 : index
    %57 = vector.load %arg3[%c0_64, %c0_65] : memref<1x128xf32, #tpu.memory_space<vmem>>, vector<1x128xf32>
    %58 = vector.broadcast %57 : vector<1x128xf32> to vector<64x128xf32>
    %59 = arith.addf %56, %58 : vector<64x128xf32>
    %c0_66 = arith.constant 0 : index
    %c0_67 = arith.constant 0 : index
    %c0_68 = arith.constant 0 : index
    %60 = vector.load %arg4[%c0_66, %c0_67, %c0_68] : memref<1x64x128xf32, #tpu.memory_space<vmem>>, vector<1x64x128xf32>
    %61 = vector.shape_cast %60 : vector<1x64x128xf32> to vector<64x128xf32>
    %62 = vector.shape_cast %59 : vector<64x128xf32> to vector<1x64x128xf32>
    tpu.vector_store %arg4[%c0_66, %c0_67, %c0_68], %62 {strides = array<i32>} : memref<1x64x128xf32, #tpu.memory_space<vmem>>, vector<1x64x128xf32>,
    return
  }
  func.func @transform_0(%arg0: i32) -> (i32, i32, i32, i32, i32) {
    %c0_i32 = arith.constant 0 : i32
    %c0_i32_0 = arith.constant 0 : i32
    %c0_i32_1 = arith.constant 0 : i32
    %c0_i32_2 = arith.constant 0 : i32
    %c0_i32_3 = arith.constant 0 : i32
    return %arg0, %c0_i32, %c0_i32_0, %c0_i32_1, %c0_i32_2 : i32, i32, i32, i32, i32
  }
  func.func @transform_1(%arg0: i32) -> (i32, i32, i32) {
    %c0_i32 = arith.constant 0 : i32
    %c0_i32_0 = arith.constant 0 : i32
    %c0_i32_1 = arith.constant 0 : i32
    %c0_i32_2 = arith.constant 0 : i32
    return %c0_i32, %c0_i32_0, %c0_i32_1 : i32, i32, i32
  }
  func.func @transform_2(%arg0: i32) -> (i32, i32) {
    %c0_i32 = arith.constant 0 : i32
    %c0_i32_0 = arith.constant 0 : i32
    %c0_i32_1 = arith.constant 0 : i32
    return %c0_i32, %c0_i32_0 : i32, i32
  }
  func.func @transform_3(%arg0: i32) -> (i32, i32, i32) {
    %c0_i32 = arith.constant 0 : i32
    %c0_i32_0 = arith.constant 0 : i32
    %c0_i32_1 = arith.constant 0 : i32
    return %arg0, %c0_i32, %c0_i32_0 : i32, i32, i32
  }
}

</mosaic_0001>

<bundles_post_ra>
// kernel: tpu_custom_call.1
= control target key start
LH: loop header
LB: loop body
LE: loop exit
PB: predicated region body
PF: predicated region fallthrough
CT: control target
= control target key end

     0   :  { %8 = vsyncpa [#allocation3], 0  ;;  %s2077_s0 = inlined_call_operand.vmem [shape: bf16[2,9,2,9,8], index: 0, kind: input, shape index: {}]   ;;  %s2078_s1 = inlined_call_operand.vmem [shape: bf16[8,8,128], index: 1, kind: input, shape index: {}]   ;;  %s2079_s2 = inlined_call_operand.vmem [shape: f32[1,128], index: 2, kind: input, shape index: {}]   ;;  %s2080_s3 = inlined_call_operand.hbm [shape: f32[2,64,128], index: 3, kind: output, shape index: {}]  }
   0x1   :  { %10 = vsyncpa [#allocation3 + $0x1], 0  ;;  %s1687_s12 = smov 0   ;;  %s1689_s13 = smov 0  }
   0x2   :  { %s1691_s14 = smov 0   ;;  %s1693_s15 = smov 0  }
   0x3 LB: > { %s1708_s16 = sadd.s32 4294967295, %s1663_s15   ;;  %s1355_s17 = sadd.s32 4294967294, %s1663_s15   ;;  %s1663_s15 = sphi %s1693_s15, %s2088_s15   ;;  %s1659_s14 = sphi %s1691_s14, %s2087_s14   ;;  %s1655_s13 = sphi %s1689_s13, %s2086_s13   ;;  %s1651_s12 = sphi %s1687_s12, %s2085_s12  }
   0x4   : > { %s1712_s18 = sadd.s32 1, %s1663_s15   ;;  %s91_s19 = sadd.s32 1, %s1659_s14 }
   0x5   : > { %s88_s20 = ssub.s32 %s1663_s15, %s1712_s18  ;;  %p101_p0 = scmp.ne.s32.totalorder %s1659_s14, %s1655_s13 }
   0x6   : > { %p89_p1 = scmp.eq.s32.totalorder %s88_s20, 0  ;;  %p102_p2 = scmp.eq.s32.totalorder %s1708_s16, 1 }
   0x7   : > { %p107_p3 = scmp.ne.s32.totalorder %s1655_s13, %s1651_s12  ;;  %p108_p4 = scmp.eq.s32.totalorder %s1355_s17, 1 }
   0x8   : > { %s1723_s21 = scalar_select %p89_p1, %s1659_s14, %s91_s19  }
   0x9   : > { %p1725_p5 = por %p102_p2, %p101_p0  ;;  %p1729_p6 = por %p108_p4, %p107_p3 }
   0xa   : > { %p1358_p7 = scmp.ge.s32.totalorder %s1663_s15, 1  ;;  %p140_p8 = scmp.lt.s32.totalorder %s1663_s15, 3 }
   0xc   : > { %p141_p9 = pnand %p1358_p7, %p140_p8 }
   0xd   : > { %p164_p10 = scmp.lt.s32.totalorder (!%p141_p9), %s1708_s16, 1  ;;  %s161_s27 = sand.u32 (!%p141_p9), 1, %s1655_s13  }
   0xe   : > { %144 = sbr.rel (%p141_p9) target bundleno = 304 (0x130), region = 32  ;;  %s1359_s28 = sshll.u32 (!%p141_p9), %s161_s27, 6 }
   0xf   : > { %s2012_s4 = scalar_lea.vmem (!%p141_p9), [#allocation2], %s1359_s28  ;;  %s1557_s5 = sshll.u32 (!%p141_p9), %s1708_s16, 6 }
  0x10   : > { %s1290_s9 = sshll.u32 (!%p141_p9), %s2012_s4, 4  ;;  %s1621_s24 = scalar_lea.hbm (!%p141_p9), %s2080_s3, 128  ;;  %s1291_s9 = int_to_ptr.vmem [resolvable:$true] %s1290_s9 }
  0x13   : > { %vm329_vm0 = vcmask 1043456   ;;  %v1394_v0 = vld [vmem:[%s2078_s1 + $0x8] sm:$0xf]  ;;  %v178_v2 = vld [vmem:[%s2078_s1] sm:$0xf]  ;;  %s165_s30 = scalar_select %p164_p10, %s1708_s16, 1 }
  0x14   : > { %v470_v1 = vsel %vm329_vm0, %v1394_v0, 0  ;;  %v1361_v3 = vld [vmem:[%s2078_s1 + $0x4] sm:$0xf]  ;;  %v395_v4 = vsel %vm329_vm0, %v178_v2, 0  ;;  %v1431_v6 = vld [vmem:[%s2078_s1 + $0xc] sm:$0xf] }
  0x15   : > { %479 = vmatpush.bf16.msra.mxu2 %v470_v1  ;;  %v331_v5 = vsel %vm329_vm0, %v1361_v3, 0  ;;  %404 = vmatpush.bf16.msra.mxu1 %v395_v4  ;;  %v664_v7 = vsel %vm329_vm0, %v1431_v6, 0  ;;  %v1494_v8 = vld [vmem:[%s2078_s1 + $0x18] sm:$0xf]  ;;  %s1558_s8 = smul.u32 144, %s165_s30  ;;  %vm316_vm2 = vcmask 64512  }
  0x16   : > { %340 = vmatpush.bf16.msra.mxu0 %v331_v5  ;;  %673 = vmatpush.bf16.msra.mxu3 %v664_v7  ;;  %v1024_v9 = vsel %vm329_vm0, %v1494_v8, 0  ;;  %vm187_vm1 = vsmask.f32 3328  ;;  %v1444_v10 = vld [vmem:[%s2078_s1 + $0x10] sm:$0xf]  ;;  %s1278_s16 = scalar_lea.sflag [#allocation3], %s161_s27 }
  0x17   : > { %v747_v11 = vsel %vm329_vm0, %v1444_v10, 0  ;;  %v1531_v12 = vld [vmem:[%s2078_s1 + $0x1c] sm:$0xf]  ;;  %v1481_v13 = vld [vmem:[%s2078_s1 + $0x14] sm:$0xf]  ;;  %s1770_s26 = scalar_lea.vmem %s2077_s0, %s1558_s8  ;;  %s1289_s8 = scalar_lea.hbm %s2080_s3, %s1557_s5 }
  0x18   : > { %vm188_vm3 = vsmask.f32 7440  ;;  %v1218_v14 = vsel %vm329_vm0, %v1531_v12, 0  ;;  %v941_v15 = vsel %vm329_vm0, %v1481_v13, 0  ;;  %v1397_v16 = vld [vmem:[%s1770_s26 + $0x8] sm:$0xf] }
  0x19   : > { %1033 = vmatpush.bf16.msrb.mxu2 %v1024_v9  ;;  %v1545_v17 = vld [vmem:[%s1770_s26 + $0x14] sm:$0xf0]  ;;  %v1368_v18 = vld [vmem:[%s1770_s26] sm:$0xf]  ;;  %950 = vmatpush.bf16.msrb.mxu1 %v941_v15  ;;  %v1541_v20 = vld [vmem:[%s1770_s26 + $0xc] sm:$0xf0] }
  0x1a   : > { %756 = vmatpush.bf16.msrb.mxu0 %v747_v11  ;;  %1227 = vmatpush.bf16.msrb.mxu3 %v1218_v14  ;;  %v1398_v19 = vor.u32 %v1545_v17, %v1397_v16  ;;  %v170_v21 = vld [vmem:[%s1770_s26] sm:$0xf]  ;;  %v171_v22 = vld [vmem:[%s1770_s26 + $0x10] sm:$0xf]  ;;  %v1369_v23 = vor.u32 %v1541_v20, %v1368_v18  ;;  %v179_v24 = vld [vmem:[%s1770_s26 + $0x4] sm:$0x1] }
  0x1b   : > { %v180_v25 = vld [vmem:[%s1770_s26 + $0x14] sm:$0x1]  ;;  %v191_v26 = vshrl.u32 %v170_v21, 16  ;;  %v194_v27 = vshll.u32 %v170_v21, 16  ;;  %v200_v28 = vshll.u32 %v179_v24, 16  ;;  %v205_v29 = vshrl.u32 %v171_v22, 16  ;;  %vm1793_vm4 = vmor %vm187_vm1, %vm188_vm3 }
  0x1c   : > { %1411 = vmatmul.msk.bf16.vlgmr.msra.gmra.mxu2 %vm316_vm2, %v1398_v19  ;;  %v208_v30 = vshll.u32 %v171_v22, 16  ;;  %v214_v31 = vshll.u32 %v180_v25, 16  ;;  %v1415_v32 = vld [vmem:[%s1770_s26 + $0x8] sm:$0xf]  ;;  %1382 = vmatmul.msk.bf16.vlgmr.msra.gmra.mxu1 %vm316_vm2, %v1369_v23  ;;  %v1416_v35 = vld [vmem:[%s1770_s26 + $0xc] sm:$0x1] }
  0x1d   : > { %v193_v33 = vrot.slane %v191_v26, 4  ;;  %v196_v34 = vrot.slane %v194_v27, 5  ;;  %v1417_v36 = vld [vmem:[%s1770_s26 + $0x18] sm:$0xf]  ;;  %v202_v37 = vrot.slane %v200_v28, 5  ;;  %v207_v38 = vrot.slane %v205_v29, 4 }
  0x1e   : > { %v210_v39 = vrot.slane %v208_v30, 5  ;;  %v216_v40 = vrot.slane %v214_v31, 5  ;;  %v1418_v41 = vld [vmem:[%s1770_s26 + $0x1c] sm:$0x1]  ;;  %v526_v43 = vshrl.u32 %v1415_v32, 16  ;;  %v529_v44 = vshll.u32 %v1415_v32, 16 }
  0x1f   : > { %v197_v42 = vor.u32 %v196_v34, %v193_v33  ;;  %v535_v45 = vshll.u32 %v1416_v35, 16  ;;  %v1789_v46 = vld [vmem:[%s1770_s26 + $0x28] sm:$0xf]  ;;  %v540_v49 = vshrl.u32 %v1417_v36, 16  ;;  %v543_v50 = vshll.u32 %v1417_v36, 16  ;;  %s1292_s10 = sshll.u32 %s1289_s8, 4  ;;  %s1293_s10 = int_to_ptr.hbm [resolvable:$true] %s1292_s10 }
  0x20   : > { %v211_v48 = vor.u32 %v210_v39, %v207_v38  ;;  %v549_v51 = vshll.u32 %v1418_v41, 16  ;;  %v1546_v52 = vld [vmem:[%s1770_s26 + $0x34] sm:$0xf0]  ;;  %v528_v54 = vrot.slane %v526_v43, 4  ;;  %v531_v55 = vrot.slane %v529_v44, 5  ;;  %s1615_s11 = sshra.s32 %s1293_s10, 4  ;;  %s1616_s11 = int_to_ptr.hbm [resolvable:$true] %s1615_s11 }
  0x21   : > { %v198_v53 = vrot.slane %v197_v42, 4  ;;  %v537_v56 = vrot.slane %v535_v45, 5  ;;  %v1372_v57 = vld [vmem:[%s1770_s26 + $0x20] sm:$0xf]  ;;  %v542_v59 = vrot.slane %v540_v49, 4  ;;  %v545_v60 = vrot.slane %v543_v50, 5  ;;  %p1622_p0 = scmp.lt.s32.totalorder %s1616_s11, %s2080_s3 }
  0x22   : > { %v212_v58 = vrot.slane %v211_v48, 4  ;;  %v551_v61 = vrot.slane %v549_v51, 5  ;;  %v1542_v62 = vld [vmem:[%s1770_s26 + $0x2c] sm:$0xf0]  ;;  %v532_v0 = vor.u32 %v531_v55, %v528_v54  ;;  %v1402_v1 = vor.u32 %v1546_v52, %v1789_v46  ;;  %v172_v3 = vld [vmem:[%s1770_s26 + $0x20] sm:$0xf] }
  0x23   : > { %v203_v63 = vsel %vm1793_vm4, %v198_v53, %v202_v37  ;;  %v1373_v2 = vor.u32 %v1542_v62, %v1372_v57  ;;  %v173_v4 = vld [vmem:[%s1770_s26 + $0x30] sm:$0xf]  ;;  %v181_v5 = vld [vmem:[%s1770_s26 + $0x24] sm:$0x1]  ;;  %v546_v8 = vor.u32 %v545_v60, %v542_v59  ;;  %v219_v9 = vshrl.u32 %v172_v3, 16  ;;  %s1617_s17 = scalar_lea.hbm %s1616_s11, 64 }
  0x24   : > { %v217_v6 = vsel %vm1793_vm4, %v212_v58, %v216_v40  ;;  %v304_v7 = vunpack.c.l.b16 %v203_v63  ;;  %v533_v11 = vrot.slane %v532_v0, 4  ;;  %v182_v12 = vld [vmem:[%s1770_s26 + $0x34] sm:$0x1]  ;;  %v222_v13 = vshll.u32 %v172_v3, 16  ;;  %v1419_v19 = vld [vmem:[%s1770_s26 + $0x28] sm:$0xf]  ;;  %p1618_p11 = scmp.ne.s32.totalorder %s1616_s11, %s1617_s17  ;;  %p1623_p1 = scmp.lt.s32.totalorder %s1621_s24, %s1617_s17 }
  0x25   : > { %v305_v10 = vunpack.c.l.b16 %v217_v6  ;;  %v228_v14 = vshll.u32 %v181_v5, 16  ;;  %v547_v15 = vrot.slane %v546_v8, 4  ;;  %v221_v16 = vrot.slane %v219_v9, 4  ;;  %v1420_v24 = vld [vmem:[%s1770_s26 + $0x2c] sm:$0x1] }
  0x26   : > { %v233_v17 = vshrl.u32 %v173_v4, 16  ;;  %v236_v18 = vshll.u32 %v173_v4, 16  ;;  %v538_v21 = vsel %vm1793_vm4, %v533_v11, %v537_v56  ;;  %v224_v22 = vrot.slane %v222_v13, 5  ;;  %v1421_v25 = vld [vmem:[%s1770_s26 + $0x38] sm:$0xf]  ;;  %p1619_p12 = pnand %p1618_p11, %p1725_p5  ;;  %p1624_p2 = por %p1623_p1, %p1622_p0 }
  0x27   : > { %v312_v20 = vpack.c.b16 %v305_v10, %v304_v7  ;;  %v230_v23 = vrot.slane %v228_v14, 5  ;;  %v552_v26 = vsel %vm1793_vm4, %v547_v15, %v551_v61  ;;  %v639_v27 = vunpack.c.l.b16 %v538_v21  ;;  %v1422_v35 = vld [vmem:[%s1770_s26 + $0x3c] sm:$0x1]  ;;  %v174_v45 = vld [vmem:[%s1770_s26 + $0x40] sm:$0xf] }
  0x28   : > { %v235_v28 = vrot.slane %v233_v17, 4  ;;  %v238_v29 = vrot.slane %v236_v18, 5  ;;  %v640_v30 = vunpack.c.l.b16 %v552_v26  ;;  %v225_v31 = vor.u32 %v224_v22, %v221_v16  ;;  %v175_v51 = vld [vmem:[%s1770_s26 + $0x50] sm:$0xf]  ;;  %v183_v60 = vld [vmem:[%s1770_s26 + $0x44] sm:$0x1]  ;;  %p1620_p13 = pneg %p1619_p12 }
  0x29   : > { %1362 = vmatmul.msk.bf16.vlgmr.msra.gmra.mxu0 %vm316_vm2, %v312_v20  ;;  %v242_v32 = vshll.u32 %v182_v12, 16  ;;  %v554_v33 = vshrl.u32 %v1419_v19, 16  ;;  %v557_v36 = vshll.u32 %v1419_v19, 16  ;;  %v563_v37 = vshll.u32 %v1420_v24, 16  ;;  %v1423_v3 = vld [vmem:[%s1770_s26 + $0x48] sm:$0xf] }
  0x2a   : > { %v239_v34 = vor.u32 %v238_v29, %v235_v28  ;;  %v568_v38 = vshrl.u32 %v1421_v25, 16  ;;  %v647_v39 = vpack.c.b16 %v640_v30, %v639_v27  ;;  %v226_v40 = vrot.slane %v225_v31, 4  ;;  %v184_v5 = vld [vmem:[%s1770_s26 + $0x54] sm:$0x1]  ;;  %v1425_v8 = vld [vmem:[%s1770_s26 + $0x58] sm:$0xf]  ;;  %p1625_p3 = pnand %p1624_p2, %p1620_p13 }
  0x2b   : > { %v244_v41 = vrot.slane %v242_v32, 5  ;;  %v556_v42 = vrot.slane %v554_v33, 4  ;;  %v559_v44 = vrot.slane %v557_v36, 5  ;;  %v571_v49 = vshll.u32 %v1421_v25, 16  ;;  %v1405_v14 = vld [vmem:[%s1770_s26 + $0x48] sm:$0xf] }
  0x2c   : > { %1412 = vmatmul.msk.bf16.gmra.mxu2 %vm316_vm2, %v1402_v1  ;;  %v240_v43 = vrot.slane %v239_v34, 4  ;;  %1432 = vmatmul.msk.bf16.vlgmr.msra.gmra.mxu3 %vm316_vm2, %v647_v39  ;;  %v231_v46 = vsel %vm1793_vm4, %v226_v40, %v230_v23  ;;  %v570_v48 = vrot.slane %v568_v38, 4  ;;  %v577_v50 = vshll.u32 %v1422_v35, 16  ;;  %v1547_v15 = vld [vmem:[%s1770_s26 + $0x54] sm:$0xf0] }
  0x2d   : > { %1383 = vmatmul.msk.bf16.gmra.mxu1 %vm316_vm2, %v1373_v2  ;;  %v560_v53 = vor.u32 %v559_v44, %v556_v42  ;;  %v565_v54 = vrot.slane %v563_v37, 5  ;;  %v306_v55 = vunpack.c.l.b16 %v231_v46  ;;  %v573_v56 = vrot.slane %v571_v49, 5  ;;  %v1376_v19 = vld [vmem:[%s1770_s26 + $0x40] sm:$0xf]  ;;  %v1424_v22 = vld [vmem:[%s1770_s26 + $0x4c] sm:$0x1] }
  0x2e   : > { %v245_v52 = vsel %vm1793_vm4, %v240_v43, %v244_v41  ;;  %v247_v57 = vshrl.u32 %v174_v45, 16  ;;  %v250_v61 = vshll.u32 %v174_v45, 16  ;;  %v261_v62 = vshrl.u32 %v175_v51, 16  ;;  %v1543_v25 = vld [vmem:[%s1770_s26 + $0x4c] sm:$0xf0] }
  0x2f   : > { %v307_v58 = vunpack.c.l.b16 %v245_v52  ;;  %v561_v59 = vrot.slane %v560_v53, 4  ;;  %v574_v63 = vor.u32 %v573_v56, %v570_v48  ;;  %v579_v0 = vrot.slane %v577_v50, 5  ;;  %v1426_v27 = vld [vmem:[%s1770_s26 + $0x5c] sm:$0x1]  ;;  %v176_v35 = vld [vmem:[%s1770_s26 + $0x60] sm:$0xf] }
  0x30   : > { %v249_v1 = vrot.slane %v247_v57, 4  ;;  %v264_v2 = vshll.u32 %v175_v51, 16  ;;  %v252_v6 = vrot.slane %v250_v61, 5  ;;  %v263_v7 = vrot.slane %v261_v62, 4  ;;  %v177_v40 = vld [vmem:[%s1770_s26 + $0x70] sm:$0xf] }
  0x31   : > { %v566_v4 = vsel %vm1793_vm4, %v561_v59, %v565_v54  ;;  %v575_v9 = vrot.slane %v574_v63, 4  ;;  %v256_v10 = vshll.u32 %v183_v60, 16  ;;  %v313_v12 = vpack.c.b16 %v307_v58, %v306_v55  ;;  %v185_v51 = vld [vmem:[%s1770_s26 + $0x64] sm:$0x1]  ;;  %v1427_v58 = vld [vmem:[%s1770_s26 + $0x68] sm:$0xf] }
  0x32   : > { %v266_v11 = vrot.slane %v264_v2, 5  ;;  %v641_v13 = vunpack.c.l.b16 %v566_v4  ;;  %v582_v16 = vshrl.u32 %v1423_v3, 16  ;;  %v585_v17 = vshll.u32 %v1423_v3, 16  ;;  %v1429_v63 = vld [vmem:[%s1770_s26 + $0x78] sm:$0xf] }
  0x33   : > { %v580_v18 = vsel %vm1793_vm4, %v575_v9, %v579_v0  ;;  %v253_v20 = vor.u32 %v252_v6, %v249_v1  ;;  %v270_v21 = vshll.u32 %v184_v5, 16  ;;  %v596_v23 = vshrl.u32 %v1425_v8, 16  ;;  %v186_v0 = vld [vmem:[%s1770_s26 + $0x74] sm:$0x1]  ;;  %v1409_v3 = vld [vmem:[%s1770_s26 + $0x68] sm:$0xf] }
  0x34   : > { %v642_v24 = vunpack.c.l.b16 %v580_v18  ;;  %v267_v26 = vor.u32 %v266_v11, %v263_v7  ;;  %v584_v28 = vrot.slane %v582_v16, 4  ;;  %v587_v29 = vrot.slane %v585_v17, 5  ;;  %v1548_v4 = vld [vmem:[%s1770_s26 + $0x74] sm:$0xf0]  ;;  %v1465_v16 = vld [vmem:[%s1770_s26 + $0x10] sm:$0xf] }
  0x35   : > { %v598_v30 = vrot.slane %v596_v23, 4  ;;  %v599_v31 = vshll.u32 %v1425_v8, 16  ;;  %v1406_v32 = vor.u32 %v1547_v15, %v1405_v14  ;;  %v591_v34 = vshll.u32 %v1424_v22, 16 }
  0x36   : > { %v588_v33 = vor.u32 %v587_v29, %v584_v28  ;;  %v648_v36 = vpack.c.b16 %v642_v24, %v641_v13  ;;  %v1377_v37 = vor.u32 %v1543_v25, %v1376_v19  ;;  %v605_v39 = vshll.u32 %v1426_v27, 16  ;;  %v1544_v19 = vld [vmem:[%s1770_s26 + $0x6c] sm:$0xf0]  ;;  %v1428_v24 = vld [vmem:[%s1770_s26 + $0x6c] sm:$0x1] }
  0x37   : > { %v601_v38 = vrot.slane %v599_v31, 5  ;;  %v254_v41 = vrot.slane %v253_v20, 4  ;;  %v258_v42 = vrot.slane %v256_v10, 5  ;;  %v268_v43 = vrot.slane %v267_v26, 4  ;;  %v1430_v28 = vld [vmem:[%s1770_s26 + $0x7c] sm:$0x1] }
  0x38   : > { %v272_v44 = vrot.slane %v270_v21, 5  ;;  %v275_v46 = vshrl.u32 %v176_v35, 16  ;;  %v278_v48 = vshll.u32 %v176_v35, 16  ;;  %v589_v49 = vrot.slane %v588_v33, 4  ;;  %v1467_v21 = vld [vmem:[%s1770_s26 + $0x20] sm:$0xf] }
  0x39   : > { %1363 = vmatmul.msk.bf16.gmra.mxu0 %vm316_vm2, %v313_v12  ;;  %v602_v45 = vor.u32 %v601_v38, %v598_v30  ;;  %v593_v50 = vrot.slane %v591_v34, 5  ;;  %v289_v52 = vshrl.u32 %v177_v40, 16  ;;  %v292_v53 = vshll.u32 %v177_v40, 16  ;;  %v1380_v12 = vld [vmem:[%s1770_s26 + $0x60] sm:$0xf] }
  0x3a   : > { %v607_v55 = vrot.slane %v605_v39, 5  ;;  %v277_v56 = vrot.slane %v275_v46, 4  ;;  %v280_v57 = vrot.slane %v278_v48, 5  ;;  %v259_v59 = vsel %vm1793_vm4, %v254_v41, %v258_v42  ;;  %v1466_v34 = vld [vmem:[%s1770_s26 + $0x14] sm:$0x1] }
  0x3b   : > { %v603_v54 = vrot.slane %v602_v45, 4  ;;  %v273_v60 = vsel %vm1793_vm4, %v268_v43, %v272_v44  ;;  %v291_v61 = vrot.slane %v289_v52, 4  ;;  %v294_v62 = vrot.slane %v292_v53, 5  ;;  %v1468_v39 = vld [vmem:[%s1770_s26 + $0x24] sm:$0x1] }
  0x3c   : > { %1413 = vmatmul.msk.bf16.gmra.mxu2 %vm316_vm2, %v1406_v32  ;;  %1433 = vmatmul.msk.bf16.gmra.mxu3 %vm316_vm2, %v648_v36  ;;  %v284_v1 = vshll.u32 %v185_v51, 16  ;;  %v594_v2 = vsel %vm1793_vm4, %v589_v49, %v593_v50  ;;  %v281_v5 = vor.u32 %v280_v57, %v277_v56  ;;  %v610_v6 = vshrl.u32 %v1427_v58, 16 }
  0x3d   : > { %1384 = vmatmul.msk.bf16.gmra.mxu1 %vm316_vm2, %v1377_v37  ;;  %v613_v7 = vshll.u32 %v1427_v58, 16  ;;  %v308_v8 = vunpack.c.l.b16 %v259_v59  ;;  %v309_v9 = vunpack.c.l.b16 %v273_v60  ;;  %v608_v10 = vsel %vm1793_vm4, %v603_v54, %v607_v55  ;;  %v1515_v58 = vld [vmem:[%s1770_s26 + $0x18] sm:$0xf]  ;;  %v1517_v59 = vld [vmem:[%s1770_s26 + $0x28] sm:$0xf] }
  0x3e   : > { %v624_v11 = vshrl.u32 %v1429_v63, 16  ;;  %v295_v13 = vor.u32 %v294_v62, %v291_v61  ;;  %v298_v14 = vshll.u32 %v186_v0, 16  ;;  %v627_v15 = vshll.u32 %v1429_v63, 16  ;;  %v1469_v0 = vld [vmem:[%s1770_s26 + $0x30] sm:$0xf] }
  0x3f   : > { %v643_v17 = vunpack.c.l.b16 %v594_v2  ;;  %v1410_v18 = vor.u32 %v1548_v4, %v1409_v3  ;;  %v286_v20 = vrot.slane %v284_v1, 5  ;;  %v644_v22 = vunpack.c.l.b16 %v608_v10 }
  0x40   : > { %v282_v23 = vrot.slane %v281_v5, 4  ;;  %v612_v25 = vrot.slane %v610_v6, 4  ;;  %v615_v26 = vrot.slane %v613_v7, 5  ;;  %v314_v27 = vpack.c.b16 %v309_v9, %v308_v8  ;;  %v1471_v5 = vld [vmem:[%s1770_s26 + $0x40] sm:$0xf] }
  0x41   : > { %v626_v29 = vrot.slane %v624_v11, 4  ;;  %v629_v30 = vrot.slane %v627_v15, 5  ;;  %v803_v31 = vshrl.u32 %v1465_v16, 16  ;;  %v296_v32 = vrot.slane %v295_v13, 4 }
  0x42   : > { %v300_v33 = vrot.slane %v298_v14, 5  ;;  %v806_v35 = vshll.u32 %v1465_v16, 16  ;;  %v817_v36 = vshrl.u32 %v1467_v21, 16  ;;  %v1381_v37 = vor.u32 %v1544_v19, %v1380_v12  ;;  %v1497_v16 = vld [vmem:[%s1770_s26 + $0x18] sm:$0xf] }
  0x43   : > { %v619_v38 = vshll.u32 %v1428_v24, 16  ;;  %v805_v40 = vrot.slane %v803_v31, 4  ;;  %v820_v41 = vshll.u32 %v1467_v21, 16  ;;  %v649_v42 = vpack.c.b16 %v644_v22, %v643_v17  ;;  %v1553_v17 = vld [vmem:[%s1770_s26 + $0x24] sm:$0xf0] }
  0x44   : > { %v287_v43 = vsel %vm1793_vm4, %v282_v23, %v286_v20  ;;  %v616_v44 = vor.u32 %v615_v26, %v612_v25  ;;  %v808_v45 = vrot.slane %v806_v35, 5  ;;  %v630_v46 = vor.u32 %v629_v30, %v626_v29  ;;  %v1516_v21 = vld [vmem:[%s1770_s26 + $0x1c] sm:$0x1]  ;;  %v1518_v26 = vld [vmem:[%s1770_s26 + $0x2c] sm:$0x1] }
  0x45   : > { %v633_v48 = vshll.u32 %v1430_v28, 16  ;;  %v819_v49 = vrot.slane %v817_v36, 4  ;;  %v822_v50 = vrot.slane %v820_v41, 5  ;;  %v301_v51 = vsel %vm1793_vm4, %v296_v32, %v300_v33  ;;  %v1470_v35 = vld [vmem:[%s1770_s26 + $0x34] sm:$0x1] }
  0x46   : > { %v809_v52 = vor.u32 %v808_v45, %v805_v40  ;;  %v812_v53 = vshll.u32 %v1466_v34, 16  ;;  %v826_v54 = vshll.u32 %v1468_v39, 16  ;;  %v310_v56 = vunpack.c.l.b16 %v287_v43  ;;  %v1472_v36 = vld [vmem:[%s1770_s26 + $0x44] sm:$0x1] }
  0x47   : > { %v823_v55 = vor.u32 %v822_v50, %v819_v49  ;;  %v621_v57 = vrot.slane %v619_v38, 5  ;;  %v311_v60 = vunpack.c.l.b16 %v301_v51  ;;  %v617_v61 = vrot.slane %v616_v44, 4 }
  0x48   : > { %v631_v62 = vrot.slane %v630_v46, 4  ;;  %v635_v63 = vrot.slane %v633_v48, 5  ;;  %v810_v1 = vrot.slane %v809_v52, 4  ;;  %v814_v2 = vrot.slane %v812_v53, 5 }
  0x49   : > { %1364 = vmatmul.msk.bf16.gmra.mxu0 %vm316_vm2, %v314_v27  ;;  %v824_v3 = vrot.slane %v823_v55, 4  ;;  %v828_v4 = vrot.slane %v826_v54, 5  ;;  %v1080_v6 = vshrl.u32 %v1515_v58, 16  ;;  %v1083_v7 = vshll.u32 %v1515_v58, 16  ;;  %v1521_v58 = vld [vmem:[%s1770_s26 + $0x48] sm:$0xf] }
  0x4a   : > { %v1094_v8 = vshrl.u32 %v1517_v59, 16  ;;  %v1097_v9 = vshll.u32 %v1517_v59, 16  ;;  %v831_v10 = vshrl.u32 %v1469_v0, 16  ;;  %v315_v11 = vpack.c.b16 %v311_v60, %v310_v56  ;;  %v1473_v59 = vld [vmem:[%s1770_s26 + $0x50] sm:$0xf] }
  0x4b   : > { %v622_v12 = vsel %vm1793_vm4, %v617_v61, %v621_v57  ;;  %v834_v13 = vshll.u32 %v1469_v0, 16  ;;  %v845_v14 = vshrl.u32 %v1471_v5, 16  ;;  %v636_v15 = vsel %vm1793_vm4, %v631_v62, %v635_v63  ;;  %v1519_v57 = vld [vmem:[%s1770_s26 + $0x38] sm:$0xf]  ;;  %v1475_v60 = vld [vmem:[%s1770_s26 + $0x60] sm:$0xf] }
  0x4c   : > { %1414 = vmatmul.msk.bf16.gmra.mxu2 %vm316_vm2, %v1410_v18  ;;  %1434 = vmatmul.msk.bf16.gmra.mxu3 %vm316_vm2, %v649_v42  ;;  %v815_v18 = vsel %vm1793_vm4, %v810_v1, %v814_v2  ;;  %v829_v19 = vsel %vm1793_vm4, %v824_v3, %v828_v4  ;;  %v848_v20 = vshll.u32 %v1471_v5, 16  ;;  %v1082_v22 = vrot.slane %v1080_v6, 4  ;;  %v1447_v61 = vld [vmem:[%s1770_s26 + $0x10] sm:$0xf]  ;;  %v1549_v62 = vld [vmem:[%s1770_s26 + $0x1c] sm:$0xf0] }
  0x4d   : > { %1385 = vmatmul.msk.bf16.gmra.mxu1 %vm316_vm2, %v1381_v37  ;;  %v1085_v23 = vrot.slane %v1083_v7, 5  ;;  %v1096_v24 = vrot.slane %v1094_v8, 4  ;;  %v1099_v25 = vrot.slane %v1097_v9, 5  ;;  %v833_v27 = vrot.slane %v831_v10, 4 }
  0x4e   : > { %v836_v28 = vrot.slane %v834_v13, 5  ;;  %v847_v29 = vrot.slane %v845_v14, 4  ;;  %v850_v30 = vrot.slane %v848_v20, 5  ;;  %v645_v31 = vunpack.c.l.b16 %v622_v12  ;;  %v1501_v14 = vld [vmem:[%s1770_s26 + $0x38] sm:$0xf] }
  0x4f   : > { %v646_v32 = vunpack.c.l.b16 %v636_v15  ;;  %v916_v33 = vunpack.c.l.b16 %v815_v18  ;;  %v917_v34 = vunpack.c.l.b16 %v829_v19  ;;  %v1498_v37 = vor.u32 %v1553_v17, %v1497_v16  ;;  %v1554_v17 = vld [vmem:[%s1770_s26 + $0x44] sm:$0xf0]  ;;  %v1520_v20 = vld [vmem:[%s1770_s26 + $0x3c] sm:$0x1] }
  0x50   : > { %v1086_v38 = vor.u32 %v1085_v23, %v1082_v22  ;;  %v1089_v39 = vshll.u32 %v1516_v21, 16  ;;  %v1100_v40 = vor.u32 %v1099_v25, %v1096_v24  ;;  %v1103_v41 = vshll.u32 %v1518_v26, 16  ;;  %v1522_v23 = vld [vmem:[%s1770_s26 + $0x4c] sm:$0x1] }
  0x51   : > { %v837_v42 = vor.u32 %v836_v28, %v833_v27  ;;  %v840_v43 = vshll.u32 %v1470_v35, 16  ;;  %v851_v44 = vor.u32 %v850_v30, %v847_v29  ;;  %v854_v45 = vshll.u32 %v1472_v36, 16  ;;  %v1474_v28 = vld [vmem:[%s1770_s26 + $0x54] sm:$0x1]  ;;  %v1476_v29 = vld [vmem:[%s1770_s26 + $0x64] sm:$0x1] }
  0x52   : > { %v650_v46 = vpack.c.b16 %v646_v32, %v645_v31  ;;  %v924_v48 = vpack.c.b16 %v917_v34, %v916_v33  ;;  %v1087_v49 = vrot.slane %v1086_v38, 4  ;;  %v1091_v50 = vrot.slane %v1089_v39, 5 }
  0x53   : > { %v1101_v51 = vrot.slane %v1100_v40, 4  ;;  %v1105_v52 = vrot.slane %v1103_v41, 5  ;;  %v838_v53 = vrot.slane %v837_v42, 4  ;;  %v842_v54 = vrot.slane %v840_v43, 5 }
  0x54   : > { %v852_v55 = vrot.slane %v851_v44, 4  ;;  %v856_v56 = vrot.slane %v854_v45, 5  ;;  %v1092_v63 = vsel %vm1793_vm4, %v1087_v49, %v1091_v50  ;;  %v1108_v1 = vshrl.u32 %v1519_v57, 16  ;;  %v1523_v50 = vld [vmem:[%s1770_s26 + $0x58] sm:$0xf] }
  0x55   : > { %v1106_v0 = vsel %vm1793_vm4, %v1101_v51, %v1105_v52  ;;  %v1111_v2 = vshll.u32 %v1519_v57, 16  ;;  %v843_v3 = vsel %vm1793_vm4, %v838_v53, %v842_v54  ;;  %v1122_v5 = vshrl.u32 %v1521_v58, 16  ;;  %v1525_v51 = vld [vmem:[%s1770_s26 + $0x68] sm:$0xf]  ;;  %v1477_v52 = vld [vmem:[%s1770_s26 + $0x70] sm:$0xf] }
  0x56   : > { %v857_v4 = vsel %vm1793_vm4, %v852_v55, %v856_v56  ;;  %v1125_v6 = vshll.u32 %v1521_v58, 16  ;;  %v859_v7 = vshrl.u32 %v1473_v59, 16  ;;  %v862_v8 = vshll.u32 %v1473_v59, 16  ;;  %v1479_v53 = vld [vmem:[%s1770_s26 + $0x80] sm:$0xf] }
  0x57   : > { %v873_v9 = vshrl.u32 %v1475_v60, 16  ;;  %v876_v10 = vshll.u32 %v1475_v60, 16  ;;  %v1193_v12 = vunpack.c.l.b16 %v1092_v63  ;;  %v1194_v13 = vunpack.c.l.b16 %v1106_v0  ;;  %v1451_v54 = vld [vmem:[%s1770_s26 + $0x30] sm:$0xf]  ;;  %v1550_v55 = vld [vmem:[%s1770_s26 + $0x3c] sm:$0xf0] }
  0x58   : > { %v1110_v15 = vrot.slane %v1108_v1, 4  ;;  %v1113_v16 = vrot.slane %v1111_v2, 5  ;;  %v918_v18 = vunpack.c.l.b16 %v843_v3  ;;  %v919_v19 = vunpack.c.l.b16 %v857_v4 }
  0x59   : > { %1365 = vmatmul.msk.bf16.gmra.mxu0 %vm316_vm2, %v315_v11  ;;  %v1448_v11 = vor.u32 %v1549_v62, %v1447_v61  ;;  %v1124_v21 = vrot.slane %v1122_v5, 4  ;;  %v1127_v22 = vrot.slane %v1125_v6, 5  ;;  %v861_v24 = vrot.slane %v859_v7, 4  ;;  %v1505_v7 = vld [vmem:[%s1770_s26 + $0x58] sm:$0xf] }
  0x5a   : > { %v864_v25 = vrot.slane %v862_v8, 5  ;;  %v875_v26 = vrot.slane %v873_v9, 4  ;;  %v878_v27 = vrot.slane %v876_v10, 5  ;;  %v1201_v30 = vpack.c.b16 %v1194_v13, %v1193_v12  ;;  %v1555_v10 = vld [vmem:[%s1770_s26 + $0x64] sm:$0xf0] }
  0x5b   : > { %v1502_v31 = vor.u32 %v1554_v17, %v1501_v14  ;;  %v1117_v32 = vshll.u32 %v1520_v20, 16  ;;  %v925_v33 = vpack.c.b16 %v919_v19, %v918_v18  ;;  %v1114_v34 = vor.u32 %v1113_v16, %v1110_v15  ;;  %v1524_v13 = vld [vmem:[%s1770_s26 + $0x5c] sm:$0x1]  ;;  %v1526_v16 = vld [vmem:[%s1770_s26 + $0x6c] sm:$0x1] }
  0x5c   : > { %1511 = vmatmul.msk.bf16.vlgmr.msrb.gmra.mxu2 %vm316_vm2, %v1498_v37  ;;  %1435 = vmatmul.msk.bf16.gmra.mxu3 %vm316_vm2, %v650_v46  ;;  %v1128_v35 = vor.u32 %v1127_v22, %v1124_v21  ;;  %v1131_v36 = vshll.u32 %v1522_v23, 16  ;;  %v865_v37 = vor.u32 %v864_v25, %v861_v24  ;;  %v868_v38 = vshll.u32 %v1474_v28, 16  ;;  %v1478_v21 = vld [vmem:[%s1770_s26 + $0x74] sm:$0x1]  ;;  %v1480_v22 = vld [vmem:[%s1770_s26 + $0x84] sm:$0x1] }
  0x5d   : > { %1482 = vmatmul.msk.bf16.vlgmr.msrb.gmra.mxu1 %vm316_vm2, %v924_v48  ;;  %v879_v39 = vor.u32 %v878_v27, %v875_v26  ;;  %v882_v40 = vshll.u32 %v1476_v29, 16  ;;  %v1115_v41 = vrot.slane %v1114_v34, 4  ;;  %v1119_v42 = vrot.slane %v1117_v32, 5 }
  0x5e   : > { %v1129_v43 = vrot.slane %v1128_v35, 4  ;;  %v1133_v44 = vrot.slane %v1131_v36, 5  ;;  %v866_v45 = vrot.slane %v865_v37, 4  ;;  %v870_v46 = vrot.slane %v868_v38, 5 }
  0x5f   : > { %v880_v48 = vrot.slane %v879_v39, 4  ;;  %v884_v49 = vrot.slane %v882_v40, 5  ;;  %v1120_v56 = vsel %vm1793_vm4, %v1115_v41, %v1119_v42  ;;  %v1136_v58 = vshrl.u32 %v1523_v50, 16  ;;  %v1527_v42 = vld [vmem:[%s1770_s26 + $0x78] sm:$0xf] }
  0x60   : > { %v1134_v57 = vsel %vm1793_vm4, %v1129_v43, %v1133_v44  ;;  %v1139_v59 = vshll.u32 %v1523_v50, 16  ;;  %v871_v60 = vsel %vm1793_vm4, %v866_v45, %v870_v46  ;;  %v1150_v62 = vshrl.u32 %v1525_v51, 16  ;;  %v1529_v43 = vld [vmem:[%s1770_s26 + $0x88] sm:$0xf]  ;;  %v1455_v44 = vld [vmem:[%s1770_s26 + $0x50] sm:$0xf] }
  0x61   : > { %v885_v61 = vsel %vm1793_vm4, %v880_v48, %v884_v49  ;;  %v1153_v63 = vshll.u32 %v1525_v51, 16  ;;  %v887_v0 = vshrl.u32 %v1477_v52, 16  ;;  %v890_v1 = vshll.u32 %v1477_v52, 16  ;;  %v1551_v45 = vld [vmem:[%s1770_s26 + $0x5c] sm:$0xf0] }
  0x62   : > { %v901_v2 = vshrl.u32 %v1479_v53, 16  ;;  %v904_v3 = vshll.u32 %v1479_v53, 16  ;;  %v1452_v4 = vor.u32 %v1550_v55, %v1451_v54  ;;  %v1195_v5 = vunpack.c.l.b16 %v1120_v56 }
  0x63   : > { %v1196_v6 = vunpack.c.l.b16 %v1134_v57  ;;  %v1138_v8 = vrot.slane %v1136_v58, 4  ;;  %v1141_v9 = vrot.slane %v1139_v59, 5  ;;  %v921_v12 = vunpack.c.l.b16 %v885_v61  ;;  %v1509_v58 = vld [vmem:[%s1770_s26 + $0x78] sm:$0xf]  ;;  %v1556_v59 = vld [vmem:[%s1770_s26 + $0x84] sm:$0xf0] }
  0x64   : > { %v1152_v14 = vrot.slane %v1150_v62, 4  ;;  %v1155_v15 = vrot.slane %v1153_v63, 5  ;;  %v889_v17 = vrot.slane %v887_v0, 4  ;;  %v892_v18 = vrot.slane %v890_v1, 5 }
  0x65   : > { %v903_v19 = vrot.slane %v901_v2, 4  ;;  %v906_v20 = vrot.slane %v904_v3, 5  ;;  %v1202_v23 = vpack.c.b16 %v1196_v6, %v1195_v5  ;;  %v1506_v24 = vor.u32 %v1555_v10, %v1505_v7  ;;  %v1528_v2 = vld [vmem:[%s1770_s26 + $0x7c] sm:$0x1]  ;;  %v1530_v3 = vld [vmem:[%s1770_s26 + $0x8c] sm:$0x1] }
  0x66   : > { %v1145_v25 = vshll.u32 %v1524_v13, 16  ;;  %v1142_v27 = vor.u32 %v1141_v9, %v1138_v8  ;;  %v1156_v28 = vor.u32 %v1155_v15, %v1152_v14  ;;  %v1159_v29 = vshll.u32 %v1526_v16, 16  ;;  %v1459_v15 = vld [vmem:[%s1770_s26 + $0x70] sm:$0xf]  ;;  %v1552_v16 = vld [vmem:[%s1770_s26 + $0x7c] sm:$0xf0] }
  0x67   : > { %v907_v32 = vor.u32 %v906_v20, %v903_v19  ;;  %v1164_v49 = vshrl.u32 %v1527_v42, 16  ;;  %v1167_v50 = vshll.u32 %v1527_v42, 16  ;;  %v1178_v53 = vshrl.u32 %v1529_v43, 16 }
  0x68   : > { %v1143_v34 = vrot.slane %v1142_v27, 4  ;;  %v1147_v35 = vrot.slane %v1145_v25, 5  ;;  %v1157_v36 = vrot.slane %v1156_v28, 4  ;;  %v1161_v37 = vrot.slane %v1159_v29, 5 }
  0x69   : > { %1461 = vmatmul.msk.bf16.vlgmr.msrb.gmra.mxu0 %vm316_vm2, %v1448_v11  ;;  %v920_v11 = vunpack.c.l.b16 %v871_v60  ;;  %v908_v40 = vrot.slane %v907_v32, 4  ;;  %v1181_v54 = vshll.u32 %v1529_v43, 16  ;;  %v1456_v55 = vor.u32 %v1551_v45, %v1455_v44 }
  0x6a   : > { %v1148_v46 = vsel %vm1793_vm4, %v1143_v34, %v1147_v35  ;;  %v1162_v48 = vsel %vm1793_vm4, %v1157_v36, %v1161_v37  ;;  %v1166_v62 = vrot.slane %v1164_v49, 4  ;;  %v1169_v63 = vrot.slane %v1167_v50, 5 }
  0x6b   : > { %v926_v26 = vpack.c.b16 %v921_v12, %v920_v11  ;;  %v1197_v56 = vunpack.c.l.b16 %v1148_v46  ;;  %v1198_v57 = vunpack.c.l.b16 %v1162_v48  ;;  %v1180_v0 = vrot.slane %v1178_v53, 4 }
  0x6c   : > { %1512 = vmatmul.msk.bf16.gmra.mxu2 %vm316_vm2, %v1502_v31  ;;  %1532 = vmatmul.msk.bf16.vlgmr.msrb.gmra.mxu3 %vm316_vm2, %v1201_v30  ;;  %v893_v30 = vor.u32 %v892_v18, %v889_v17  ;;  %v896_v31 = vshll.u32 %v1478_v21, 16  ;;  %v1183_v1 = vrot.slane %v1181_v54, 5  ;;  %v1170_v7 = vor.u32 %v1169_v63, %v1166_v62 }
  0x6d   : > { %1483 = vmatmul.msk.bf16.gmra.mxu1 %vm316_vm2, %v925_v33  ;;  %v910_v33 = vshll.u32 %v1480_v22, 16  ;;  %v1203_v5 = vpack.c.b16 %v1198_v57, %v1197_v56  ;;  %v1173_v8 = vshll.u32 %v1528_v2, 16  ;;  %v1187_v10 = vshll.u32 %v1530_v3, 16 }
  0x6e   : > { %v894_v38 = vrot.slane %v893_v30, 4  ;;  %v898_v39 = vrot.slane %v896_v31, 5  ;;  %v1184_v9 = vor.u32 %v1183_v1, %v1180_v0  ;;  %v1171_v11 = vrot.slane %v1170_v7, 4 }
  0x6f   : > { %v912_v41 = vrot.slane %v910_v33, 5  ;;  %v1175_v12 = vrot.slane %v1173_v8, 5  ;;  %v1189_v14 = vrot.slane %v1187_v10, 5  ;;  %v1460_v19 = vor.u32 %v1552_v16, %v1459_v15  ;;  %v2009_v8 = vld [vmem:[%s2079_s2] ss:$0 sm:$0xff] }
  0x70   : > { %v899_v51 = vsel %vm1793_vm4, %v894_v38, %v898_v39  ;;  %v1185_v13 = vrot.slane %v1184_v9, 4 }
  0x71   : > { %v913_v52 = vsel %vm1793_vm4, %v908_v40, %v912_v41  ;;  %v922_v60 = vunpack.c.l.b16 %v899_v51  ;;  %v1176_v17 = vsel %vm1793_vm4, %v1171_v11, %v1175_v12 }
  0x72   : > { %v923_v61 = vunpack.c.l.b16 %v913_v52  ;;  %v1190_v18 = vsel %vm1793_vm4, %v1185_v13, %v1189_v14  ;;  %v1199_v20 = vunpack.c.l.b16 %v1176_v17 }
  0x73   : > { %v1200_v21 = vunpack.c.l.b16 %v1190_v18 }
  0x74   : > { %v927_v6 = vpack.c.b16 %v923_v61, %v922_v60 }
  0x75   : > { %v1204_v22 = vpack.c.b16 %v1200_v21, %v1199_v20 }
  0x79   : > { %1462 = vmatmul.msk.bf16.gmra.mxu0 %vm316_vm2, %v1452_v4  ;;  %v1510_v4 = vor.u32 %v1556_v59, %v1509_v58 }
  0x7c   : > { %1513 = vmatmul.msk.bf16.gmra.mxu2 %vm316_vm2, %v1506_v24  ;;  %1533 = vmatmul.msk.bf16.gmra.mxu3 %vm316_vm2, %v1202_v23 }
  0x7d   : > { %1484 = vmatmul.msk.bf16.gmra.mxu1 %vm316_vm2, %v926_v26 }
  0x89   : > { %1463 = vmatmul.msk.bf16.gmra.mxu0 %vm316_vm2, %v1456_v55 }
  0x8c   : > { %1514 = vmatmul.msk.bf16.gmra.mxu2 %vm316_vm2, %v1510_v4  ;;  %1534 = vmatmul.msk.bf16.gmra.mxu3 %vm316_vm2, %v1203_v5 }
  0x8d   : > { %1485 = vmatmul.msk.bf16.gmra.mxu1 %vm316_vm2, %v927_v6 }
  0x99   : > { %1464 = vmatmul.msk.bf16.gmra.mxu0 %vm316_vm2, %v1460_v19  ;;  %v406_v23 = vpop.f32.mrf.mxu1 }
  0x9c   : > { %1535 = vmatmul.msk.bf16.gmra.mxu3 %vm316_vm2, %v1204_v22 }
  0x9f   : > { %v481_v24 = vpop.f32.mrf.mxu2 }
  0xa1   : > { %v408_v25 = vpop.f32.mrf.mxu1 }
  0xa6   : > { %v342_v26 = vpop.f32.mrf.mxu0 }
  0xa7   : > { %v483_v27 = vpop.f32.mrf.mxu2  ;;  %v407_v54 = vadd.f32 %v406_v23, %v342_v26 }
  0xa9   : > { %v501_v57 = vadd.f32 %v481_v24, %v407_v54 }
  0xaa   : > { %v411_v28 = vpop.f32.mrf.mxu1 }
  0xae   : > { %v344_v29 = vpop.f32.mrf.mxu0 }
  0xaf   : > { %v486_v30 = vpop.f32.mrf.mxu2  ;;  %v675_v31 = vpop.f32.mrf.mxu3  ;;  %v409_v61 = vadd.f32 %v408_v25, %v344_v29 }
  0xb0   : > { %v695_v59 = vadd.f32 %v675_v31, %v501_v57 }
  0xb1   : > { %v502_v2 = vadd.f32 %v483_v27, %v409_v61 }
  0xb2   : > { %v413_v32 = vpop.f32.mrf.mxu1 }
  0xb6   : > { %v347_v47 = vpop.f32.mrf.mxu0 }
  0xb7   : > { %v488_v33 = vpop.f32.mrf.mxu2  ;;  %v677_v34 = vpop.f32.mrf.mxu3  ;;  %v412_v7 = vadd.f32 %v411_v28, %v347_v47 }
  0xb8   : > { %v696_v3 = vadd.f32 %v677_v34, %v502_v2 }
  0xb9   : > { %v503_v14 = vadd.f32 %v486_v30, %v412_v7 }
  0xba   : > { %v1975_v35 = vpop.f32.mrf.mxu1 }
  0xbe   : > { %v349_v36 = vpop.f32.mrf.mxu0 }
  0xbf   : > { %v1977_v37 = vpop.f32.mrf.mxu2  ;;  %v680_v38 = vpop.f32.mrf.mxu3  ;;  %v414_v19 = vadd.f32 %v413_v32, %v349_v36 }
  0xc0   : > { %v697_v16 = vadd.f32 %v680_v38, %v503_v14 }
  0xc1   : > { %v504_v25 = vadd.f32 %v488_v33, %v414_v19 }
  0xc2   : > { %v1979_v39 = vpop.f32.mrf.mxu1 }
  0xc6   : > { %v352_v40 = vpop.f32.mrf.mxu0 }
  0xc7   : > { %v1981_v41 = vpop.f32.mrf.mxu2  ;;  %v682_v42 = vpop.f32.mrf.mxu3  ;;  %v417_v31 = vadd.f32 %v1975_v35, %v352_v40 }
  0xc8   : > { %v698_v28 = vadd.f32 %v682_v42, %v504_v25 }
  0xca   : > { %v1983_v43 = vpop.f32.mrf.mxu1 }
  0xce   : > { %v1985_v44 = vpop.f32.mrf.mxu0 }
  0xcf   : > { %v1987_v45 = vpop.f32.mrf.mxu2  ;;  %v685_v46 = vpop.f32.mrf.mxu3 }
  0xd2   : > { %v1989_v48 = vpop.f32.mrf.mxu1 }
  0xd6   : > { %v1991_v49 = vpop.f32.mrf.mxu0 }
  0xd7   : > { %v1993_v50 = vpop.f32.mrf.mxu2  ;;  %v1995_v51 = vpop.f32.mrf.mxu3  ;;  %v422_v2 = vadd.f32 %v1983_v43, %v1991_v49 }
  0xda   : > { %v952_v52 = vpop.f32.mrf.mxu1 }
  0xde   : > { %v1997_v53 = vpop.f32.mrf.mxu0 }
  0xdf   : > { %v1035_v55 = vpop.f32.mrf.mxu2  ;;  %v1999_v56 = vpop.f32.mrf.mxu3 }
  0xe2   : > { %v954_v58 = vpop.f32.mrf.mxu1 }
  0xe6   : > { %v758_v60 = vpop.f32.mrf.mxu0 }
  0xe7   : > { %v778_v62 = vadd.f32 %v758_v60, %v695_v59  ;;  %v2001_v63 = vpop.f32.mrf.mxu3  ;;  %v1037_v0 = vpop.f32.mrf.mxu2 }
  0xe9   : > { %v972_v1 = vadd.f32 %v952_v52, %v778_v62  ;;  %v505_v52 = vadd.f32 %v1977_v37, %v417_v31 }
  0xea   : > { %v957_v6 = vpop.f32.mrf.mxu1 }
  0xeb   : > { %v1055_v4 = vadd.f32 %v1035_v55, %v972_v1  ;;  %v699_v54 = vadd.f32 %v685_v46, %v505_v52 }
  0xee   : > { %v760_v5 = vpop.f32.mrf.mxu0 }
  0xef   : > { %v779_v9 = vadd.f32 %v760_v5, %v696_v3  ;;  %v1229_v10 = vpop.f32.mrf.mxu3  ;;  %v1040_v13 = vpop.f32.mrf.mxu2 }
  0xf0   : > { %v1249_v11 = vadd.f32 %v1229_v10, %v1055_v4 }
  0xf1   : > { %v973_v12 = vadd.f32 %v954_v58, %v779_v9  ;;  %v419_v58 = vadd.f32 %v1979_v39, %v1985_v44 }
  0xf2   : > { %v1261_v15 = vadd.f32 %v2009_v8, %v1249_v11  ;;  %v959_v22 = vpop.f32.mrf.mxu1  ;;  %v424_v11 = vadd.f32 %v1989_v48, %v1997_v53 }
  0xf3   : > { %v1056_v17 = vadd.f32 %v1037_v0, %v973_v12  ;;  %v506_v61 = vadd.f32 %v1981_v41, %v419_v58 }
  0xf4   : > { %1269 = vst [vmem:[%s2012_s4] sm:$0xff] %v1261_v15 }
  0xf5   : > { %v700_v0 = vadd.f32 %v1995_v51, %v506_v61 }
  0xf6   : > { %v763_v18 = vpop.f32.mrf.mxu0 }
  0xf7   : > { %v780_v20 = vadd.f32 %v763_v18, %v697_v16  ;;  %v1231_v21 = vpop.f32.mrf.mxu3  ;;  %v1042_v27 = vpop.f32.mrf.mxu2 }
  0xf8   : > { %v1250_v23 = vadd.f32 %v1231_v21, %v1056_v17 }
  0xf9   : > { %v974_v24 = vadd.f32 %v957_v6, %v780_v20  ;;  %v507_v6 = vadd.f32 %v1987_v45, %v422_v2  ;;  %v508_v45 = vadd.f32 %v1993_v50, %v424_v11 }
  0xfa   : > { %v1262_v26 = vadd.f32 %v2009_v8, %v1250_v23  ;;  %v962_v36 = vpop.f32.mrf.mxu1 }
  0xfb   : > { %v1057_v29 = vadd.f32 %v1040_v13, %v974_v24  ;;  %v701_v7 = vadd.f32 %v1999_v56, %v507_v6  ;;  %v702_v56 = vadd.f32 %v2001_v63, %v508_v45 }
  0xfc   : > { %1270 = vst [vmem:[%s2012_s4 + $0x8] sm:$0xff] %v1262_v26 }
  0xfe   : > { %v765_v30 = vpop.f32.mrf.mxu0 }
  0xff   : > { %v781_v47 = vadd.f32 %v765_v30, %v698_v28  ;;  %v1234_v34 = vpop.f32.mrf.mxu3  ;;  %v1045_v57 = vpop.f32.mrf.mxu2 }
 0x100   : > { %v1251_v38 = vadd.f32 %v1234_v34, %v1057_v29 }
 0x101   : > { %v975_v32 = vadd.f32 %v959_v22, %v781_v47 }
 0x102   : > { %v1263_v33 = vadd.f32 %v2009_v8, %v1251_v38  ;;  %v964_v62 = vpop.f32.mrf.mxu1 }
 0x103   : > { %v1058_v55 = vadd.f32 %v1042_v27, %v975_v32 }
 0x104   : > { %1271 = vst [vmem:[%s2012_s4 + $0x10] sm:$0xff] %v1263_v33 }
 0x106   : > { %v768_v42 = vpop.f32.mrf.mxu0 }
 0x107   : > { %v782_v59 = vadd.f32 %v768_v42, %v699_v54  ;;  %v1236_v35 = vpop.f32.mrf.mxu3  ;;  %v1047_v39 = vpop.f32.mrf.mxu2 }
 0x108   : > { %v1252_v40 = vadd.f32 %v1236_v35, %v1058_v55 }
 0x109   : > { %v976_v60 = vadd.f32 %v962_v36, %v782_v59 }
 0x10a   : > { %v1264_v37 = vadd.f32 %v2009_v8, %v1252_v40  ;;  %v967_v9 = vpop.f32.mrf.mxu1 }
 0x10b   : > { %v1059_v46 = vadd.f32 %v1045_v57, %v976_v60 }
 0x10c   : > { %1272 = vst [vmem:[%s2012_s4 + $0x18] sm:$0xff] %v1264_v37 }
 0x10e   : > { %v770_v1 = vpop.f32.mrf.mxu0 }
 0x10f   : > { %v783_v3 = vadd.f32 %v770_v1, %v700_v0  ;;  %v1239_v44 = vpop.f32.mrf.mxu3  ;;  %v1050_v14 = vpop.f32.mrf.mxu2 }
 0x110   : > { %v1253_v4 = vadd.f32 %v1239_v44, %v1059_v46 }
 0x111   : > { %v977_v5 = vadd.f32 %v964_v62, %v783_v3 }
 0x112   : > { %v1265_v41 = vadd.f32 %v2009_v8, %v1253_v4  ;;  %v969_v19 = vpop.f32.mrf.mxu1 }
 0x113   : > { %v1060_v51 = vadd.f32 %v1047_v39, %v977_v5 }
 0x114   : > { %1273 = vst [vmem:[%s2012_s4 + $0x20] sm:$0xff] %v1265_v41 }
 0x116   : > { %v773_v10 = vpop.f32.mrf.mxu0 }
 0x117   : > { %v784_v43 = vadd.f32 %v773_v10, %v701_v7  ;;  %v1241_v49 = vpop.f32.mrf.mxu3  ;;  %v1052_v22 = vpop.f32.mrf.mxu2 }
 0x118   : > { %v1254_v12 = vadd.f32 %v1241_v49, %v1060_v51 }
 0x119   : > { %v978_v13 = vadd.f32 %v967_v9, %v784_v43 }
 0x11a   : > { %v1266_v15 = vadd.f32 %v2009_v8, %v1254_v12 }
 0x11b   : > { %v1061_v16 = vadd.f32 %v1050_v14, %v978_v13 }
 0x11c   : > { %1274 = vst [vmem:[%s2012_s4 + $0x28] sm:$0xff] %v1266_v15 }
 0x11e   : > { %v775_v17 = vpop.f32.mrf.mxu0 }
 0x11f   : > { %v785_v18 = vadd.f32 %v775_v17, %v702_v56  ;;  %v1244_v48 = vpop.f32.mrf.mxu3 }
 0x120   : > { %v1255_v53 = vadd.f32 %v1244_v48, %v1061_v16 }
 0x121   : > { %v979_v20 = vadd.f32 %v969_v19, %v785_v18 }
 0x122   : > { %v1267_v21 = vadd.f32 %v2009_v8, %v1255_v53 }
 0x123   : > { %v1062_v50 = vadd.f32 %v1052_v22, %v979_v20 }
 0x124   : > { %1275 = vst [vmem:[%s2012_s4 + $0x30] sm:$0xff] %v1267_v21 }
 0x127   : > { %v1246_v63 = vpop.f32.mrf.mxu3 }
 0x128   : > { %v1256_v23 = vadd.f32 %v1246_v63, %v1062_v50 }
 0x12a   : > { %v1268_v24 = vadd.f32 %v2009_v8, %v1256_v23 }
 0x12c   : > { %1276 = vst [vmem:[%s2012_s4 + $0x38] sm:$0xff] %v1268_v24 }
 0x12d   : > { %1628 = shalt.err (!%p1625_p3)
}
 0x12e   : > { %s1665_s27 = smov 128   ;;  %s1666_s28 = smov 8  }
 0x12f   : > { %1559 = dma.vmem_to_hbm [thread:$0]  (%p1725_p5), %s1291_s9, 1024, %s1293_s10, %s1278_s16, %s1665_s27, %s1665_s27, %s1666_s28  }
 0x130 PF: > { %p1565_p4 = scmp.ge.s32.totalorder %s1663_s15, 2  ;;  %s1307_s29 = sand.u32 1, %s1651_s12  }
 0x131   : > { %s1308_s30 = scalar_lea.sflag [#allocation3], %s1307_s29 }
 0x132   : > { %p1562_p7 = pnand %p1565_p4, %p1729_p6 }
 0x134   : > { %p1563_p8 = pneg %p1562_p7 }
 0x136   : > { %1646 = dma.done.wait (%p1563_p8), %s1308_s30, 1024  }
 0x137   : > { %1648 = vsyncadd (%p1563_p8), %s1308_s30, 4294966272  ;;  %p13_p9 = scmp.ge.s32.totalorder %s1712_s18, 4   ;;  %s2085_s12 = smov %s1655_s13 }
 0x138   : > { %s2086_s13 = smov %s1659_s14  ;;  %s2087_s14 = smov %s1723_s21 }
 0x139   : > { %s2088_s15 = smov %s1712_s18  ;;  %15 = sbr.rel (!%p13_p9) target bundleno = 3 (0x3), region = 77 }
 0x13e   :  { %1314 = vsyncpa [#allocation3], 1 }
 0x13f   :  { %1316 = vsyncpa [#allocation3 + $0x1], 1 }

</bundles_post_ra>
